<compile_context>
chip_gen: v7x
topology: tpu7x:2x2x1
jax: 0.10.0
libtpu: 0.0.40
codegen_flags: <defaults>
</compile_context>

<pallas_src>
import jax
import jax.numpy as jnp
import numpy as np
from jax.experimental import pallas as pl
from jax.experimental.pallas import tpu as pltpu


def _round_up(x, m):
    return ((x + m - 1) // m) * m


def spgat_kernel(x_ref, w_ref, a1_ref, a2_ref, s_ref, d_ref, out_ref,
                 h_sc, p1_sc, p2_sc, den_sc):
    """One edge-tile step. Grid: (num_edge_tiles,); edge axis = scatter reduction."""
    e_step = pl.program_id(0)

    @pl.when(e_step == 0)
    def _init():
        # h = X @ W (f32, padded to Fp lanes) -- computed once, lives in VMEM.
        h = jnp.dot(x_ref[...], w_ref[...], preferred_element_type=jnp.float32)
        h_sc[...] = h
        # Per-node attention projections: logit[e] = p1[src[e]] + p2[dst[e]].
        p1_sc[...] = jnp.dot(h, a1_ref[...], preferred_element_type=jnp.float32)
        p2_sc[...] = jnp.dot(h, a2_ref[...], preferred_element_type=jnp.float32)
        den_sc[...] = jnp.zeros_like(den_sc)
        out_ref[...] = jnp.zeros_like(out_ref)

    # bf16 one-hot tiles (exact 0/1) -> f32 once per tile; value math stays f32.
    s_blk = s_ref[...].astype(jnp.float32)                        # (te, N)
    d_blk = d_ref[...].astype(jnp.float32)                        # (te, N)

    # Per-edge logits from per-node scalars (no (te, Fp) h_src gather).
    logits = (jnp.dot(s_blk, p1_sc[...], preferred_element_type=jnp.float32)
              + jnp.dot(d_blk, p2_sc[...], preferred_element_type=jnp.float32))
    edge_e = jnp.exp(-jnp.tanh(logits))                           # (te, 1)

    # Gather h at destination nodes (MXU); weight the scatter one-hot by edge_e
    # (te*N VPU ops instead of te*Fp on the value slab).
    h_dst = jnp.dot(d_blk, h_sc[...], preferred_element_type=jnp.float32)  # (te, Fp)
    s_w = s_blk * edge_e                                          # (te, N)

    # Scatter-add over source node: contract the edge axis directly
    # (no S.T operand materialized in HBM).
    contract_edge = (((0,), (0,)), ((), ()))
    out_ref[...] += jax.lax.dot_general(
        s_w, h_dst, dimension_numbers=contract_edge,
        preferred_element_type=jnp.float32)                       # (N, Fp)
    den_sc[...] += jax.lax.dot_general(
        s_blk, edge_e, dimension_numbers=contract_edge,
        preferred_element_type=jnp.float32)                       # (N, 1)

    @pl.when(e_step == pl.num_programs(0) - 1)
    def _finalize():
        out_ref[...] = out_ref[...] / (den_sc[...] + jnp.float32(1e-8))


def sp_graph_attention_forward(x, W, a, edge_index, *, edge_tile=512):
    """x: (N, Fin) f32; W: (Fin, Fout) f32; a: (1, 2*Fout) f32; edge_index: (2, E) i32."""
    N, Fin = x.shape
    Fout = W.shape[1]
    E = edge_index.shape[1]

    # Lane-dense padded feature width (unmasked vst on the output accumulator).
    Fp = _round_up(Fout, 128)

    # Edge tiling (reduction axis); multiples of 16 for bf16 sublane packing.
    te = _round_up(max(16, min(edge_tile, _round_up(E, 16))), 16)
    E_pad = _round_up(E, te)
    src = edge_index[0].astype(jnp.int32)
    dst = edge_index[1].astype(jnp.int32)
    if E_pad != E:
        # Out-of-range index N -> all-zero one-hot rows: padded edges contribute
        # nothing to the scatter or the row-sum.
        pad = jnp.full((E_pad - E,), N, dtype=jnp.int32)
        src = jnp.concatenate([src, pad])
        dst = jnp.concatenate([dst, pad])

    # Index plumbing (glue): one-hot gather/scatter matrices in bf16 (0/1 exact).
    S = jax.nn.one_hot(src, N, dtype=jnp.bfloat16)                # (E_pad, N)
    D = jax.nn.one_hot(dst, N, dtype=jnp.bfloat16)                # (E_pad, N)

    Wp = jnp.zeros((Fin, Fp), jnp.float32).at[:, :Fout].set(W.astype(jnp.float32))
    a1t = jnp.zeros((Fp, 1), jnp.float32).at[:Fout, 0].set(a[0, :Fout])
    a2t = jnp.zeros((Fp, 1), jnp.float32).at[:Fout, 0].set(a[0, Fout:])

    num_tiles = E_pad // te

    flops = int(2 * N * Fin * Fp + 4 * N * Fp
                + 4 * E_pad * N * Fp + 8 * E_pad * N)
    bytes_accessed = int(2 * E_pad * N * 2
                         + (N * Fin + Fin * Fp + 2 * Fp + N * Fp) * 4)

    out = pl.pallas_call(
        spgat_kernel,
        grid=(num_tiles,),
        in_specs=[
            pl.BlockSpec((N, Fin), lambda e: (0, 0)),   # x      (resident)
            pl.BlockSpec((Fin, Fp), lambda e: (0, 0)),  # W pad  (resident)
            pl.BlockSpec((Fp, 1), lambda e: (0, 0)),    # a1^T   (resident)
            pl.BlockSpec((Fp, 1), lambda e: (0, 0)),    # a2^T   (resident)
            pl.BlockSpec((te, N), lambda e: (e, 0)),    # S tile (streamed, bf16)
            pl.BlockSpec((te, N), lambda e: (e, 0)),    # D tile (streamed, bf16)
        ],
        out_specs=pl.BlockSpec((N, Fp), lambda e: (0, 0)),
        out_shape=jax.ShapeDtypeStruct((N, Fp), jnp.float32),
        scratch_shapes=[
            pltpu.VMEM((N, Fp), jnp.float32),   # h
            pltpu.VMEM((N, 1), jnp.float32),    # p1 = h @ a1
            pltpu.VMEM((N, 1), jnp.float32),    # p2 = h @ a2
            pltpu.VMEM((N, 1), jnp.float32),    # e_rowsum accumulator
        ],
        compiler_params=pltpu.CompilerParams(
            dimension_semantics=("arbitrary",)),
        cost_estimate=pl.CostEstimate(
            flops=flops,
            transcendentals=int(2 * E_pad),
            bytes_accessed=bytes_accessed),
    )(x.astype(jnp.float32), Wp, a1t, a2t, S, D)

    return out[:, :Fout]


def reference_forward(x, W, a, edge_index):
    """Pure-JAX reference matching the PyTorch forward (single-input path)."""
    N = x.shape[0]
    src, dst = edge_index[0], edge_index[1]
    h = x @ W
    edge_h = jnp.concatenate([h[src], h[dst]], axis=1)          # (E, 2F)
    edge_e = jnp.exp(-jnp.tanh(edge_h @ a[0]))                  # (E,)
    e_rowsum = jax.ops.segment_sum(edge_e, src, num_segments=N) + 1e-8
    h_prime = jax.ops.segment_sum(edge_e[:, None] * h[dst], src, num_segments=N)
    return h_prime / e_rowsum[:, None]


if __name__ == "__main__":
    key = jax.random.PRNGKey(0)
    N, Fin, Fout, E = 16, 8, 32, 48

    k_x, k_w, k_a, k_src, k_dst = jax.random.split(key, 5)
    x = jax.random.normal(k_x, (N, Fin), dtype=jnp.float32)

    # W: xavier_normal_ (gain=1) -> std = sqrt(2 / (fan_in + fan_out))
    xavier_std = float(np.sqrt(2.0 / (Fin + Fout)))
    W = xavier_std * jax.random.normal(k_w, (Fin, Fout), dtype=jnp.float32)
    # a: module init is zeros; small random values so tanh/exp path is exercised.
    a = 0.1 * jax.random.normal(k_a, (1, 2 * Fout), dtype=jnp.float32)

    src = jax.random.randint(k_src, (E,), 0, N, dtype=jnp.int32)
    dst = jax.random.randint(k_dst, (E,), 0, N, dtype=jnp.int32)
    edge_index = jnp.stack([src, dst], axis=0)                  # (2, E)

    # edge_tile=16 -> 3-step edge grid: exercises init / accumulate / finalize.
    out = sp_graph_attention_forward(x, W, a, edge_index, edge_tile=16)
    out = jax.block_until_ready(out)

    ref = reference_forward(x, W, a, edge_index)
    np.testing.assert_allclose(np.asarray(out), np.asarray(ref), rtol=5e-5, atol=1e-5)

    print("KERNEL_OK")
</pallas_src>

<mosaic_0001>
module attributes {stable_mosaic.version = 11 : i64} {
  func.func @spgat_kernel(%arg0: i32, %arg1: memref<16x8xf32, #tpu.memory_space<vmem>>, %arg2: memref<8x128xf32, #tpu.memory_space<vmem>>, %arg3: memref<128x1xf32, #tpu.memory_space<vmem>>, %arg4: memref<128x1xf32, #tpu.memory_space<vmem>>, %arg5: memref<16x16xbf16, #tpu.memory_space<vmem>>, %arg6: memref<16x16xbf16, #tpu.memory_space<vmem>>, %arg7: memref<16x128xf32, #tpu.memory_space<vmem>>, %arg8: memref<16x128xf32, #tpu.memory_space<vmem>>, %arg9: memref<16x1xf32, #tpu.memory_space<vmem>>, %arg10: memref<16x1xf32, #tpu.memory_space<vmem>>, %arg11: memref<16x1xf32, #tpu.memory_space<vmem>>) attributes {dimension_semantics = [#tpu.dimension_semantics<arbitrary>], iteration_bounds = array<i64: 3>, scalar_prefetch = 0 : i64, scratch_operands = 4 : i64, tpu.core_type = #tpu.core_type<tc>, window_params = [{pipeline_mode = #tpu.pipeline_mode<synchronous>, transform_indices = @transform_0, window_bounds = array<i64: 16, 8>}, {pipeline_mode = #tpu.pipeline_mode<synchronous>, transform_indices = @transform_1, window_bounds = array<i64: 8, 128>}, {pipeline_mode = #tpu.pipeline_mode<synchronous>, transform_indices = @transform_2, window_bounds = array<i64: 128, 1>}, {pipeline_mode = #tpu.pipeline_mode<synchronous>, transform_indices = @transform_3, window_bounds = array<i64: 128, 1>}, {transform_indices = @transform_4, window_bounds = array<i64: 16, 16>}, {transform_indices = @transform_5, window_bounds = array<i64: 16, 16>}, {pipeline_mode = #tpu.pipeline_mode<synchronous>, transform_indices = @transform_6, window_bounds = array<i64: 16, 128>}]} {
    %c0_i32 = arith.constant 0 : i32
    %0 = arith.cmpi eq, %arg0, %c0_i32 : i32
    %1 = arith.extui %0 : i1 to i32
    %c0_i32_0 = arith.constant 0 : i32
    %2 = arith.cmpi ne, %1, %c0_i32_0 : i32
    scf.if %2 {
      %c0_24 = arith.constant 0 : index
      %c0_25 = arith.constant 0 : index
      %31 = vector.load %arg1[%c0_24, %c0_25] : memref<16x8xf32, #tpu.memory_space<vmem>>, vector<16x8xf32>
      %c0_26 = arith.constant 0 : index
      %c0_27 = arith.constant 0 : index
      %32 = vector.load %arg2[%c0_26, %c0_27] : memref<8x128xf32, #tpu.memory_space<vmem>>, vector<8x128xf32>
      %cst_28 = arith.constant dense<0.000000e+00> : vector<16x128xf32>
      %33 = tpu.matmul %31, %32, %cst_28 {dimension_numbers = #tpu.dot_dimension_numbers<[1], [0], [0], [1], [0, 0, 1, 1], [], []>} : vector<16x8xf32>, vector<8x128xf32>, vector<16x128xf32> -> vector<16x128xf32>
      %c0_29 = arith.constant 0 : index
      %c0_30 = arith.constant 0 : index
      %34 = vector.load %arg8[%c0_29, %c0_30] : memref<16x128xf32, #tpu.memory_space<vmem>>, vector<16x128xf32>
      tpu.vector_store %arg8[%c0_29, %c0_30], %33 {strides = array<i32>} : memref<16x128xf32, #tpu.memory_space<vmem>>, vector<16x128xf32>,
      %c0_31 = arith.constant 0 : index
      %c0_32 = arith.constant 0 : index
      %35 = vector.load %arg3[%c0_31, %c0_32] : memref<128x1xf32, #tpu.memory_space<vmem>>, vector<128x1xf32>
      %cst_33 = arith.constant dense<0.000000e+00> : vector<16x1xf32>
      %36 = tpu.matmul %33, %35, %cst_33 {dimension_numbers = #tpu.dot_dimension_numbers<[1], [0], [0], [1], [0, 0, 1, 1], [], []>} : vector<16x128xf32>, vector<128x1xf32>, vector<16x1xf32> -> vector<16x1xf32>
      %c0_34 = arith.constant 0 : index
      %c0_35 = arith.constant 0 : index
      %37 = vector.load %arg9[%c0_34, %c0_35] : memref<16x1xf32, #tpu.memory_space<vmem>>, vector<16x1xf32>
      tpu.vector_store %arg9[%c0_34, %c0_35], %36 {strides = array<i32>} : memref<16x1xf32, #tpu.memory_space<vmem>>, vector<16x1xf32>,
      %c0_36 = arith.constant 0 : index
      %c0_37 = arith.constant 0 : index
      %38 = vector.load %arg4[%c0_36, %c0_37] : memref<128x1xf32, #tpu.memory_space<vmem>>, vector<128x1xf32>
      %cst_38 = arith.constant dense<0.000000e+00> : vector<16x1xf32>
      %39 = tpu.matmul %33, %38, %cst_38 {dimension_numbers = #tpu.dot_dimension_numbers<[1], [0], [0], [1], [0, 0, 1, 1], [], []>} : vector<16x128xf32>, vector<128x1xf32>, vector<16x1xf32> -> vector<16x1xf32>
      %c0_39 = arith.constant 0 : index
      %c0_40 = arith.constant 0 : index
      %40 = vector.load %arg10[%c0_39, %c0_40] : memref<16x1xf32, #tpu.memory_space<vmem>>, vector<16x1xf32>
      tpu.vector_store %arg10[%c0_39, %c0_40], %39 {strides = array<i32>} : memref<16x1xf32, #tpu.memory_space<vmem>>, vector<16x1xf32>,
      %cst_41 = arith.constant 0.000000e+00 : f32
      %41 = vector.broadcast %cst_41 : f32 to vector<16x1xf32>
      %c0_42 = arith.constant 0 : index
      %c0_43 = arith.constant 0 : index
      %42 = vector.load %arg11[%c0_42, %c0_43] : memref<16x1xf32, #tpu.memory_space<vmem>>, vector<16x1xf32>
      tpu.vector_store %arg11[%c0_42, %c0_43], %41 {strides = array<i32>} : memref<16x1xf32, #tpu.memory_space<vmem>>, vector<16x1xf32>,
      %cst_44 = arith.constant 0.000000e+00 : f32
      %43 = vector.broadcast %cst_44 : f32 to vector<16x128xf32>
      %c0_45 = arith.constant 0 : index
      %c0_46 = arith.constant 0 : index
      %44 = vector.load %arg7[%c0_45, %c0_46] : memref<16x128xf32, #tpu.memory_space<vmem>>, vector<16x128xf32>
      tpu.vector_store %arg7[%c0_45, %c0_46], %43 {strides = array<i32>} : memref<16x128xf32, #tpu.memory_space<vmem>>, vector<16x128xf32>,
    } else {
    }
    %c0 = arith.constant 0 : index
    %c0_1 = arith.constant 0 : index
    %3 = vector.load %arg5[%c0, %c0_1] : memref<16x16xbf16, #tpu.memory_space<vmem>>, vector<16x16xbf16>
    %4 = arith.extf %3 : vector<16x16xbf16> to vector<16x16xf32>
    %c0_2 = arith.constant 0 : index
    %c0_3 = arith.constant 0 : index
    %5 = vector.load %arg6[%c0_2, %c0_3] : memref<16x16xbf16, #tpu.memory_space<vmem>>, vector<16x16xbf16>
    %6 = arith.extf %5 : vector<16x16xbf16> to vector<16x16xf32>
    %c0_4 = arith.constant 0 : index
    %c0_5 = arith.constant 0 : index
    %7 = vector.load %arg9[%c0_4, %c0_5] : memref<16x1xf32, #tpu.memory_space<vmem>>, vector<16x1xf32>
    %cst = arith.constant dense<0.000000e+00> : vector<16x1xf32>
    %8 = tpu.matmul %4, %7, %cst {dimension_numbers = #tpu.dot_dimension_numbers<[1], [0], [0], [1], [0, 0, 1, 1], [], []>} : vector<16x16xf32>, vector<16x1xf32>, vector<16x1xf32> -> vector<16x1xf32>
    %c0_6 = arith.constant 0 : index
    %c0_7 = arith.constant 0 : index
    %9 = vector.load %arg10[%c0_6, %c0_7] : memref<16x1xf32, #tpu.memory_space<vmem>>, vector<16x1xf32>
    %cst_8 = arith.constant dense<0.000000e+00> : vector<16x1xf32>
    %10 = tpu.matmul %6, %9, %cst_8 {dimension_numbers = #tpu.dot_dimension_numbers<[1], [0], [0], [1], [0, 0, 1, 1], [], []>} : vector<16x16xf32>, vector<16x1xf32>, vector<16x1xf32> -> vector<16x1xf32>
    %11 = arith.addf %8, %10 : vector<16x1xf32>
    %12 = math.tanh %11 : vector<16x1xf32>
    %cst_9 = arith.constant 0.000000e+00 : f32
    %13 = vector.broadcast %cst_9 : f32 to vector<16x1xf32>
    %14 = arith.subf %13, %12 : vector<16x1xf32>
    %15 = math.exp %14 : vector<16x1xf32>
    %c0_10 = arith.constant 0 : index
    %c0_11 = arith.constant 0 : index
    %16 = vector.load %arg8[%c0_10, %c0_11] : memref<16x128xf32, #tpu.memory_space<vmem>>, vector<16x128xf32>
    %cst_12 = arith.constant dense<0.000000e+00> : vector<16x128xf32>
    %17 = tpu.matmul %6, %16, %cst_12 {dimension_numbers = #tpu.dot_dimension_numbers<[1], [0], [0], [1], [0, 0, 1, 1], [], []>} : vector<16x16xf32>, vector<16x128xf32>, vector<16x128xf32> -> vector<16x128xf32>
    %18 = vector.broadcast %15 : vector<16x1xf32> to vector<16x16xf32>
    %19 = arith.mulf %4, %18 : vector<16x16xf32>
    %c0_13 = arith.constant 0 : index
    %c0_14 = arith.constant 0 : index
    %20 = vector.load %arg7[%c0_13, %c0_14] : memref<16x128xf32, #tpu.memory_space<vmem>>, vector<16x128xf32>
    %cst_15 = arith.constant dense<0.000000e+00> : vector<16x128xf32>
    %21 = tpu.matmul %19, %17, %cst_15 {dimension_numbers = #tpu.dot_dimension_numbers<[0], [0], [1], [1], [0, 1, 1, 1], [], []>} : vector<16x16xf32>, vector<16x128xf32>, vector<16x128xf32> -> vector<16x128xf32>
    %22 = arith.addf %20, %21 : vector<16x128xf32>
    %c0_16 = arith.constant 0 : index
    %c0_17 = arith.constant 0 : index
    %23 = vector.load %arg7[%c0_16, %c0_17] : memref<16x128xf32, #tpu.memory_space<vmem>>, vector<16x128xf32>
    tpu.vector_store %arg7[%c0_16, %c0_17], %22 {strides = array<i32>} : memref<16x128xf32, #tpu.memory_space<vmem>>, vector<16x128xf32>,
    %c0_18 = arith.constant 0 : index
    %c0_19 = arith.constant 0 : index
    %24 = vector.load %arg11[%c0_18, %c0_19] : memref<16x1xf32, #tpu.memory_space<vmem>>, vector<16x1xf32>
    %cst_20 = arith.constant dense<0.000000e+00> : vector<16x1xf32>
    %25 = tpu.matmul %4, %15, %cst_20 {dimension_numbers = #tpu.dot_dimension_numbers<[0], [0], [1], [1], [0, 1, 1, 1], [], []>} : vector<16x16xf32>, vector<16x1xf32>, vector<16x1xf32> -> vector<16x1xf32>
    %26 = arith.addf %24, %25 : vector<16x1xf32>
    %c0_21 = arith.constant 0 : index
    %c0_22 = arith.constant 0 : index
    %27 = vector.load %arg11[%c0_21, %c0_22] : memref<16x1xf32, #tpu.memory_space<vmem>>, vector<16x1xf32>
    tpu.vector_store %arg11[%c0_21, %c0_22], %26 {strides = array<i32>} : memref<16x1xf32, #tpu.memory_space<vmem>>, vector<16x1xf32>,
    %c2_i32 = arith.constant 2 : i32
    %28 = arith.cmpi eq, %arg0, %c2_i32 : i32
    %29 = arith.extui %28 : i1 to i32
    %c0_i32_23 = arith.constant 0 : i32
    %30 = arith.cmpi ne, %29, %c0_i32_23 : i32
    scf.if %30 {
      %c0_24 = arith.constant 0 : index
      %c0_25 = arith.constant 0 : index
      %31 = vector.load %arg7[%c0_24, %c0_25] : memref<16x128xf32, #tpu.memory_space<vmem>>, vector<16x128xf32>
      %c0_26 = arith.constant 0 : index
      %c0_27 = arith.constant 0 : index
      %32 = vector.load %arg11[%c0_26, %c0_27] : memref<16x1xf32, #tpu.memory_space<vmem>>, vector<16x1xf32>
      %cst_28 = arith.constant 9.99999993E-9 : f32
      %33 = vector.broadcast %cst_28 : f32 to vector<16x1xf32>
      %34 = arith.addf %32, %33 : vector<16x1xf32>
      %35 = vector.broadcast %34 : vector<16x1xf32> to vector<16x128xf32>
      %36 = arith.divf %31, %35 : vector<16x128xf32>
      %c0_29 = arith.constant 0 : index
      %c0_30 = arith.constant 0 : index
      %37 = vector.load %arg7[%c0_29, %c0_30] : memref<16x128xf32, #tpu.memory_space<vmem>>, vector<16x128xf32>
      tpu.vector_store %arg7[%c0_29, %c0_30], %36 {strides = array<i32>} : memref<16x128xf32, #tpu.memory_space<vmem>>, vector<16x128xf32>,
    } else {
    }
    return
  }
  func.func @transform_0(%arg0: i32) -> (i32, i32) {
    %c0_i32 = arith.constant 0 : i32
    %c0_i32_0 = arith.constant 0 : i32
    %c0_i32_1 = arith.constant 0 : i32
    return %c0_i32, %c0_i32_0 : i32, i32
  }
  func.func @transform_1(%arg0: i32) -> (i32, i32) {
    %c0_i32 = arith.constant 0 : i32
    %c0_i32_0 = arith.constant 0 : i32
    %c0_i32_1 = arith.constant 0 : i32
    return %c0_i32, %c0_i32_0 : i32, i32
  }
  func.func @transform_2(%arg0: i32) -> (i32, i32) {
    %c0_i32 = arith.constant 0 : i32
    %c0_i32_0 = arith.constant 0 : i32
    %c0_i32_1 = arith.constant 0 : i32
    return %c0_i32, %c0_i32_0 : i32, i32
  }
  func.func @transform_3(%arg0: i32) -> (i32, i32) {
    %c0_i32 = arith.constant 0 : i32
    %c0_i32_0 = arith.constant 0 : i32
    %c0_i32_1 = arith.constant 0 : i32
    return %c0_i32, %c0_i32_0 : i32, i32
  }
  func.func @transform_4(%arg0: i32) -> (i32, i32) {
    %c0_i32 = arith.constant 0 : i32
    %c0_i32_0 = arith.constant 0 : i32
    return %arg0, %c0_i32 : i32, i32
  }
  func.func @transform_5(%arg0: i32) -> (i32, i32) {
    %c0_i32 = arith.constant 0 : i32
    %c0_i32_0 = arith.constant 0 : i32
    return %arg0, %c0_i32 : i32, i32
  }
  func.func @transform_6(%arg0: i32) -> (i32, i32) {
    %c0_i32 = arith.constant 0 : i32
    %c0_i32_0 = arith.constant 0 : i32
    %c0_i32_1 = arith.constant 0 : i32
    return %c0_i32, %c0_i32_0 : i32, i32
  }
}

</mosaic_0001>

<bundles_post_ra>
// kernel: tpu_custom_call.1
= control target key start
LH: loop header
LB: loop body
LE: loop exit
PB: predicated region body
PF: predicated region fallthrough
CT: control target
= control target key end

     0   :  { %11 = vsyncpa [#allocation7], 0  ;;  %s1544_s21 = smov 0   ;;  %s1710_s0 = inlined_call_operand.vmem [shape: f32[16,8], index: 0, kind: input, shape index: {}]   ;;  %s1711_s1 = inlined_call_operand.vmem [shape: f32[8,128], index: 1, kind: input, shape index: {}]   ;;  %s1712_s2 = inlined_call_operand.vmem [shape: f32[128,1], index: 2, kind: input, shape index: {}]   ;;  %s1713_s3 = inlined_call_operand.vmem [shape: f32[128,1], index: 3, kind: input, shape index: {}]   ;;  %s1714_s4 = inlined_call_operand.vmem [shape: bf16[48,16], index: 4, kind: input, shape index: {}]   ;;  %s1715_s5 = inlined_call_operand.vmem [shape: bf16[48,16], index: 5, kind: input, shape index: {}]   ;;  %s1716_s6 = inlined_call_operand.hbm [shape: f32[16,128], index: 6, kind: output, shape index: {}]  }
   0x1 LB: > { %s1550_s22 = sadd.s32 4294967295, %s1501_s21   ;;  %p1144_p0 = scmp.ge.s32.totalorder %s1501_s21, 1  ;;  %s1501_s21 = sphi %s1544_s21, %s17_s21  }
   0x2   : > { %p220_p1 = scmp.lt.s32.totalorder %s1501_s21, 4 }
   0x4   : > { %p221_p2 = pnand %p1144_p0, %p220_p1 }
   0x5   : > { %s1145_s23 = sshll.u32 (!%p221_p2), %s1550_s22, 1  ;;  %p1149_p4 = scmp.ne.s32.totalorder (!%p221_p2), %s1550_s22, 0 }
   0x6   : > { %224 = sbr.rel (%p221_p2) target bundleno = 1269 (0x4f5), region = 44  ;;  %p251_p3 = scmp.lt.s32.totalorder (!%p221_p2), %s1145_s23, 5 }
   0xd   : > { %s1718_s23 = smov (!%p251_p3, %s1145_s23), 5  ;;  %265 = sbr.rel (%p1149_p4) target bundleno = 445 (0x1bd), region = 48 }
   0xe   : > { %s1146_s24 = sshll.u32 %s1718_s23, 2  ;;  %v268_v0 = vld [vmem:[%s1711_s1] sm:$0xff] (!%p1149_p4)  ;;  %vm269_vm0 = vcmask (!%p1149_p4), 64512   ;;  %v267_v2 = vld [vmem:[%s1710_s0 + $0x8] sm:$0xff] (!%p1149_p4)  ;;  %v355_v8 = vld [vmem:[%s1712_s2 + $0x10] sm:$0xff] (!%p1149_p4)  ;;  %vm444_vm1 = vcmask (!%p1149_p4), 7168  }
   0xf   : > { %s1558_s27 = scalar_lea.vmem %s1714_s4, %s1146_s24  ;;  %s1563_s30 = scalar_lea.vmem %s1715_s5, %s1146_s24  ;;  %v266_v1 = vld [vmem:[%s1710_s0] sm:$0xff] (!%p1149_p4)  ;;  %1234 = vmatprep.subr.mxu0 (!%p1149_p4), %v268_v0  ;;  %v354_v4 = vld [vmem:[%s1712_s2 + $0x8] sm:$0xff] (!%p1149_p4)  ;;  %v356_v9 = vld [vmem:[%s1712_s2 + $0x18] sm:$0xff] (!%p1149_p4)  ;;  %v1503_v53 = vmov (!%p1149_p4), 0.0  }
  0x10   : > { %1236 = vmatprep.mubr.msk.f32.mxu0 (!%p1149_p4), %vm269_vm0, %v266_v1  ;;  %v353_v3 = vld [vmem:[%s1712_s2] sm:$0xff] (!%p1149_p4)  ;;  %1235 = vmatpush3.msra.mxu0 (!%p1149_p4), %v268_v0  ;;  %v448_v7 = vld [vmem:[%s1713_s3 + $0x8] sm:$0xff] (!%p1149_p4)  ;;  %v1348_v11 = vpack.c.bf16 (!%p1149_p4), %v356_v9, %v355_v8  ;;  %v449_v12 = vld [vmem:[%s1713_s3 + $0x10] sm:$0xff] (!%p1149_p4)  ;;  %540 = vst.msk [vmem:[#allocation5] sm:$0xff] (!%p1149_p4), %vm444_vm1, %v1503_v53 }
  0x11   : > { %v447_v5 = vld [vmem:[%s1713_s3] sm:$0xff] (!%p1149_p4)  ;;  %v1344_v6 = vpack.c.bf16 (!%p1149_p4), %v354_v4, %v353_v3  ;;  %1237 = vmatmul.mubr.msk.f32.vlgmr.msra.gmra.mrb[0].mxu0 (!%p1149_p4), %vm269_vm0, %v267_v2  ;;  %v450_v13 = vld [vmem:[%s1713_s3 + $0x18] sm:$0xff] (!%p1149_p4)  ;;  %v358_v16 = vld [vmem:[%s1712_s2 + $0x28] sm:$0xff] (!%p1149_p4)  ;;  %541 = vst.msk [vmem:[#allocation5 + $0x8] sm:$0xff] (!%p1149_p4), %vm444_vm1, %v1503_v53 }
  0x12   : > { %v1376_v10 = vpack.c.bf16 (!%p1149_p4), %v448_v7, %v447_v5  ;;  %v357_v14 = vld [vmem:[%s1712_s2 + $0x20] sm:$0xff] (!%p1149_p4)  ;;  %v1380_v15 = vpack.c.bf16 (!%p1149_p4), %v450_v13, %v449_v12  ;;  %v452_v18 = vld [vmem:[%s1713_s3 + $0x28] sm:$0xff] (!%p1149_p4)  ;;  %v359_v21 = vld [vmem:[%s1712_s2 + $0x30] sm:$0xff] (!%p1149_p4)  ;;  %542 = vst [vmem:[#allocation6] sm:$0xff] (!%p1149_p4), %v1503_v53 }
  0x13   : > { %1345 = vmatprep.subr.bf16.mxu1 (!%p1149_p4), %v1344_v6  ;;  %v451_v17 = vld [vmem:[%s1713_s3 + $0x20] sm:$0xff] (!%p1149_p4)  ;;  %v1352_v19 = vpack.c.bf16 (!%p1149_p4), %v358_v16, %v357_v14  ;;  %v360_v22 = vld [vmem:[%s1712_s2 + $0x38] sm:$0xff] (!%p1149_p4)  ;;  %v453_v23 = vld [vmem:[%s1713_s3 + $0x30] sm:$0xff] (!%p1149_p4)  ;;  %543 = vst [vmem:[#allocation6 + $0x8] sm:$0xff] (!%p1149_p4), %v1503_v53 }
  0x14   : > { %1377 = vmatprep.subr.bf16.mxu0 %v1376_v10  ;;  %1347 = vmatpush3.bf16.msra.mxu1 %v1344_v6  ;;  %v1384_v20 = vpack.c.bf16 %v452_v18, %v451_v17  ;;  %v454_v24 = vld [vmem:[%s1713_s3 + $0x38] sm:$0xff]  ;;  %v1356_v25 = vpack.c.bf16 %v360_v22, %v359_v21  ;;  %v361_v27 = vld [vmem:[%s1712_s2 + $0x40] sm:$0xff]  ;;  %v362_v28 = vld [vmem:[%s1712_s2 + $0x48] sm:$0xff] }
  0x15   : > { %1379 = vmatpush3.bf16.msra.mxu0 %v1376_v10  ;;  %1349 = vmatprep.subr.bf16.mxu1 %v1348_v11  ;;  %v1388_v26 = vpack.c.bf16 %v454_v24, %v453_v23  ;;  %v455_v29 = vld [vmem:[%s1713_s3 + $0x40] sm:$0xff]  ;;  %v456_v30 = vld [vmem:[%s1713_s3 + $0x48] sm:$0xff]  ;;  %v1360_v31 = vpack.c.bf16 %v362_v28, %v361_v27  ;;  %v363_v33 = vld [vmem:[%s1712_s2 + $0x50] sm:$0xff] }
  0x16   : > { %1381 = vmatprep.subr.bf16.mxu0 %v1380_v15  ;;  %v1392_v32 = vpack.c.bf16 %v456_v30, %v455_v29  ;;  %v364_v34 = vld [vmem:[%s1712_s2 + $0x58] sm:$0xff]  ;;  %v457_v35 = vld [vmem:[%s1713_s3 + $0x50] sm:$0xff]  ;;  %v365_v39 = vld [vmem:[%s1712_s2 + $0x60] sm:$0xff] }
  0x17   : > { %v458_v36 = vld [vmem:[%s1713_s3 + $0x58] sm:$0xff]  ;;  %v1364_v37 = vpack.c.bf16 %v364_v34, %v363_v33  ;;  %v366_v40 = vld [vmem:[%s1712_s2 + $0x68] sm:$0xff]  ;;  %v459_v41 = vld [vmem:[%s1713_s3 + $0x60] sm:$0xff] }
  0x18   : > { %1351 = vmatpush3.bf16.msra.mxu1 %v1348_v11  ;;  %v1396_v38 = vpack.c.bf16 %v458_v36, %v457_v35  ;;  %v460_v42 = vld [vmem:[%s1713_s3 + $0x68] sm:$0xff]  ;;  %v1368_v43 = vpack.c.bf16 %v366_v40, %v365_v39  ;;  %v367_v45 = vld [vmem:[%s1712_s2 + $0x70] sm:$0xff]  ;;  %v368_v46 = vld [vmem:[%s1712_s2 + $0x78] sm:$0xff] }
  0x19   : > { %1383 = vmatpush3.bf16.msra.mxu0 %v1380_v15  ;;  %1353 = vmatprep.subr.bf16.mxu1 %v1352_v19  ;;  %v1400_v44 = vpack.c.bf16 %v460_v42, %v459_v41  ;;  %v461_v47 = vld [vmem:[%s1713_s3 + $0x70] sm:$0xff]  ;;  %v462_v48 = vld [vmem:[%s1713_s3 + $0x78] sm:$0xff]  ;;  %v1372_v49 = vpack.c.bf16 %v368_v46, %v367_v45 }
  0x1a   : > { %1385 = vmatprep.subr.bf16.mxu0 %v1384_v20  ;;  %v1404_v50 = vpack.c.bf16 %v462_v48, %v461_v47 }
  0x1c   : > { %1355 = vmatpush3.bf16.msra.mxu1 %v1352_v19 }
  0x1d   : > { %1387 = vmatpush3.bf16.msra.mxu0 %v1384_v20  ;;  %1357 = vmatprep.subr.bf16.mxu1 %v1356_v25 }
  0x1e   : > { %1389 = vmatprep.subr.bf16.mxu0 %v1388_v26 }
  0x20   : > { %1359 = vmatpush3.bf16.msra.mxu1 %v1356_v25 }
  0x21   : > { %1391 = vmatpush3.bf16.msra.mxu0 %v1388_v26  ;;  %1361 = vmatprep.subr.bf16.mxu1 %v1360_v31 }
  0x22   : > { %1393 = vmatprep.subr.bf16.mxu0 %v1392_v32 }
  0x24   : > { %1363 = vmatpush3.bf16.msra.mxu1 %v1360_v31 }
  0x25   : > { %1395 = vmatpush3.bf16.msra.mxu0 %v1392_v32  ;;  %1365 = vmatprep.subr.bf16.mxu1 %v1364_v37 }
  0x26   : > { %1397 = vmatprep.subr.bf16.mxu0 %v1396_v38 }
  0x28   : > { %1367 = vmatpush3.bf16.msra.mxu1 %v1364_v37 }
  0x29   : > { %1399 = vmatpush3.bf16.msra.mxu0 %v1396_v38  ;;  %1369 = vmatprep.subr.bf16.mxu1 %v1368_v43 }
  0x2a   : > { %1401 = vmatprep.subr.bf16.mxu0 %v1400_v44 }
  0x2c   : > { %1371 = vmatpush3.bf16.msra.mxu1 %v1368_v43 }
  0x2d   : > { %1403 = vmatpush3.bf16.msra.mxu0 %v1400_v44  ;;  %1373 = vmatprep.subr.bf16.mxu1 %v1372_v49 }
  0x2e   : > { %1405 = vmatprep.subr.bf16.mxu0 %v1404_v50 }
  0x30   : > { %1375 = vmatpush3.bf16.msra.mxu1 %v1372_v49 }
  0x31   : > { %1407 = vmatpush3.bf16.msra.mxu0 %v1404_v50 }
  0xe4   : > { %v1238_v51 = vpop.f32.mrb[0].mxu0 }
  0xe5   : > { %352 = vst [vmem:[#allocation2 + $0x8] sm:$0xff] %v1238_v51  ;;  %v342_v52 = vpop.f32.mrb[1].mxu0 }
  0xe6   : > { %351 = vst [vmem:[#allocation2] sm:$0xff] %v342_v52  ;;  %1271 = vmatprep.mubr.f32.mxu1 %v342_v52  ;;  %1306 = vmatprep.mubr.f32.mxu0 %v342_v52 }
  0xe7   : > { %1272 = vmatmul.mubr.f32.vlgmr.msra.gmra.mrb[0].mxu1 %v1238_v51  ;;  %1307 = vmatmul.mubr.f32.vlgmr.msra.gmra.mrb[2].mxu0 %v1238_v51 }
 0x1ba   : > { %v1273_v54 = vpop.f32.mrb[0].mxu1  ;;  %v1308_v55 = vpop.f32.mrb[2].mxu0 }
 0x1bb   : > { %446 = vst.msk [vmem:[#allocation3 + $0x8] sm:$0xff] %vm444_vm1, %v1273_v54  ;;  %539 = vst.msk [vmem:[#allocation4 + $0x8] sm:$0xff] %vm444_vm1, %v1308_v55  ;;  %v435_v56 = vpop.f32.mrb[1].mxu1  ;;  %v529_v57 = vpop.f32.mrb[3].mxu0 }
 0x1bc   : > { %445 = vst.msk [vmem:[#allocation3] sm:$0xff] %vm444_vm1, %v435_v56  ;;  %538 = vst.msk [vmem:[#allocation4] sm:$0xff] %vm444_vm1, %v529_v57 }
 0x1bd PF: > { %v1172_v60 = vld [vmem:[%s1563_s30] sm:$0xff]   ;;  %vm556_vm2 = vcmask 130048   ;;  %v1504_v6 = vmov 0   ;;  %v728_v8 = vld [vmem:[#allocation2 + $0x8] sm:$0xff]  ;;  %vm1052_vm3 = vcmask 7168   ;;  %p1162_p5 = scmp.ne.s32.totalorder %s1550_s22, 2 }
 0x1be   : > { %v1173_v62 = vunpack.c.l.bf16 %v1172_v60  ;;  %v1168_v1 = vld [vmem:[%s1558_s27] sm:$0xff]   ;;  %v1174_v3 = vunpack.c.h.bf16 %v1172_v60  ;;  %1451 = vset.pattern.permute.xlu0 %v1504_v6  ;;  %v1505_v46 = vmov (!%p1162_p5), 0  }
 0x1bf   : > { %v1169_v4 = vunpack.c.l.bf16 %v1168_v1  ;;  %v1170_v5 = vunpack.c.h.bf16 %v1168_v1  ;;  %v727_v7 = vld [vmem:[#allocation2] sm:$0xff] }
 0x1c0   : > { %1313 = vmatprep.mubr.msk.f32.mxu0 %vm556_vm2, %v1173_v62  ;;  %1327 = vmatprep.mubr.msk.f32.mxu1 %vm556_vm2, %v1173_v62  ;;  %v1416_v9 = vpack.c.bf16 %v728_v8, %v727_v7  ;;  %v935_v33 = vld [vmem:[#allocation5] sm:$0xff] }
 0x1c1   : > { %v936_v32 = vld [vmem:[#allocation5 + $0x8] sm:$0xff] }
 0x1c2   : > { %v555_v59 = vld [vmem:[#allocation4 + $0x8] sm:$0xff]  ;;  %v553_v0 = vld [vmem:[#allocation3 + $0x8] sm:$0xff]  ;;  %1417 = vmatprep.subr.bf16.mxu1 %v1416_v9  ;;  %v816_v39 = vld [vmem:[#allocation6] sm:$0xff] }
 0x1c3   : > { %v554_v58 = vld [vmem:[#allocation4] sm:$0xff]  ;;  %v552_v63 = vld [vmem:[#allocation3] sm:$0xff]  ;;  %1419 = vmatpush3.bf16.msra.mxu1 %v1416_v9  ;;  %v817_v38 = vld [vmem:[#allocation6 + $0x8] sm:$0xff] }
 0x1c4   : > { %v1408_v61 = vpack.c.bf16 %v555_v59, %v554_v58  ;;  %v1412_v2 = vpack.c.bf16 %v553_v0, %v552_v63 }
 0x1c6   : > { %1409 = vmatprep.subr.bf16.mxu0 %v1408_v61  ;;  %1328 = vmatmul.mubr.msk.f32.vlgmr.msra.gmra.mrb[0].mxu1 %vm556_vm2, %v1174_v3 }
 0x1c7   : > { %1411 = vmatpush3.bf16.msra.mxu0 %v1408_v61 }
 0x1c8   : > { %1413 = vmatprep.subr.bf16.mxu0 %v1412_v2 }
 0x1ca   : > { %1314 = vmatmul.mubr.msk.f32.vlgmr.msra.gmra.mrb[0].mxu0 %vm556_vm2, %v1174_v3 }
 0x1cb   : > { %1415 = vmatpush3.bf16.msra.mxu0 %v1412_v2  ;;  %1320 = vmatprep.mubr.msk.f32.mxu0 %vm556_vm2, %v1169_v4 }
 0x1d2   : > { %1321 = vmatmul.mubr.msk.f32.vlgmr.msra.gmra.mrb[0].mxu0 %vm556_vm2, %v1170_v5 }
 0x299   : > { %v1329_v21 = vpop.f32.mrb[0].mxu1 }
 0x29a   : > { %v795_v22 = vpop.f32.mrb[1].mxu1 }
 0x29b   : > { %v1420_v23 = vpack.c.bf16 %v1329_v21, %v795_v22 }
 0x29d   : > { %1421 = vmatprep.subr.bf16.mxu1 %v1420_v23 }
 0x29e   : > { %1423 = vmatpush3.bf16.msra.mxu1 %v1420_v23 }
 0x2a5   : > { %v1322_v10 = vpop.f32.mrb[0].mxu0 }
 0x2a6   : > { %1452 = vtanh.f32 %v1322_v10  ;;  %v710_v11 = vpop.f32.mrb[1].mxu0 }
 0x2a7   : > { %1454 = vtanh.f32 %v710_v11 }
 0x2b0   : > { %v1453_v12 = vpop.eup %1452 }
 0x2b1   : > { %v1455_v13 = vpop.eup %1454  ;;  %v722_v14 = vsub.f32 0.0, %v1453_v12 }
 0x2b2   : > { %v721_v15 = vsub.f32 0.0, %v1455_v13 }
 0x2b3   : > { %v725_v16 = vmul.f32 1.442695, %v722_v14 }
 0x2b4   : > { %v723_v17 = vmul.f32 1.442695, %v721_v15 }
 0x2b5   : > { %1456 = vpow2.f32 %v725_v16 }
 0x2b6   : > { %1458 = vpow2.f32 %v723_v17 }
 0x2bf   : > { %v1457_v18 = vpop.eup %1456 }
 0x2c0   : > { %v1459_v19 = vpop.eup %1458 }
 0x2c1   : > { %806 = vperm.xlu0 %1451, %v1459_v19   ;;  %v1424_v20 = vpack.c.bf16 %v1457_v18, %v1459_v19 }
 0x2c3   : > { %1425 = vmatprep.subr.bf16.mxu0 %v1424_v20 }
 0x2c4   : > { %1427 = vmatpush3.bf16.msra.mxu0 %v1424_v20 }
 0x2c5   : > { %811 = vperm.xlu0 %1451, %v1457_v18  }
 0x2e3   : > { %937 = vxpose.xlu0.b32.start [1/2] (short) (narrow) %v1169_v4, 16 }
 0x2e7   : > { %938 = vxpose.xlu0.b32.end [2/2] (short) (narrow) %v1170_v5, 16 }
 0x310   : > { %1460 = vset.pattern.permute.xlu0 (!%p1162_p5), %v1505_v46 }
 0x340   : > { %v807_v24 = vpop.permute.xlu0 %806 }
 0x341   : > { %v814_v25 = vmul.f32 %v1169_v4, %v807_v24 }
 0x343   : > { %818 = vxpose.xlu1.b32.start [1/2] (short) (narrow) %v814_v25, 16 }
 0x344   : > { %v812_v26 = vpop.permute.xlu0 %811 }
 0x345   : > { %v815_v27 = vmul.f32 %v1170_v5, %v812_v26 }
 0x347   : > { %819 = vxpose.xlu1.b32.end [2/2] (short) (narrow) %v815_v27, 16 }
 0x363   : > { %v953_v28 = vpop.trf.xlu0 }
 0x364   : > { %1341 = vmatprep.mubr.msk.f32.mxu0 %vm556_vm2, %v953_v28 }
 0x367   : > { %v954_v29 = vpop.trf.xlu0 }
 0x368   : > { %1342 = vmatmul.mubr.msk.f32.vlgmr.msra.gmra.mrb[2].mxu0 %vm556_vm2, %v954_v29 }
 0x3c3   : > { %v834_v30 = vpop.trf.xlu1 }
 0x3c4   : > { %1334 = vmatprep.mubr.msk.f32.mxu1 %vm556_vm2, %v834_v30 }
 0x3c7   : > { %v835_v31 = vpop.trf.xlu1 }
 0x3c8   : > { %1335 = vmatmul.mubr.msk.f32.vlgmr.msra.gmra.mrb[2].mxu1 %vm556_vm2, %v835_v31 }
 0x43b   : > { %v1343_v34 = vpop.f32.mrb[2].mxu0 }
 0x43c   : > { %v1051_v35 = vadd.f32 %v1343_v34, %v936_v32  ;;  %v1041_v36 = vpop.f32.mrb[3].mxu0 }
 0x43d   : > { %v1050_v37 = vadd.f32 %v1041_v36, %v935_v33 }
 0x43e   : > { %1054 = vst.msk [vmem:[#allocation5 + $0x8] sm:$0xff] %vm1052_vm3, %v1051_v35 }
 0x43f   : > { %1053 = vst.msk [vmem:[#allocation5] sm:$0xff] %vm1052_vm3, %v1050_v37 }
 0x445   : > { %v1062_v45 = vld [vmem:[#allocation5 + $0x8] sm:$0xff] (!%p1162_p5) }
 0x446   : > { %v1061_v44 = vld [vmem:[#allocation5] sm:$0xff] (!%p1162_p5)  ;;  %v1064_v48 = vadd.f32 (!%p1162_p5), 1e-08, %v1062_v45 }
 0x447   : > { %v1063_v47 = vadd.f32 (!%p1162_p5), 1e-08, %v1061_v44 }
 0x449   : > { %1067 = vperm.xlu0 (!%p1162_p5), %1460, %v1063_v47  }
 0x44d   : > { %1072 = vperm.xlu0 (!%p1162_p5), %1460, %v1064_v48  }
 0x499   : > { %1058 = sbr.rel (%p1162_p5) target bundleno = 1243 (0x4db), region = 52 }
 0x49b   : > { %v1336_v40 = vpop.f32.mrb[2].mxu1 }
 0x49c   : > { %v932_v41 = vadd.f32 %v1336_v40, %v817_v38  ;;  %v922_v42 = vpop.f32.mrb[3].mxu1 }
 0x49d   : > { %v931_v43 = vadd.f32 %v922_v42, %v816_v39 }
 0x49e   : > { %934 = vst [vmem:[#allocation6 + $0x8] sm:$0xff] %v932_v41 }
 0x49f   : > { %933 = vst [vmem:[#allocation6] sm:$0xff] %v931_v43 }
 0x4a5   : > { %v1060_v54 = vld [vmem:[#allocation6 + $0x8] sm:$0xff] }
 0x4a6   : > { %v1059_v51 = vld [vmem:[#allocation6] sm:$0xff] }
 0x4c8   : > { %v1068_v49 = vpop.permute.xlu0 %1067 }
 0x4c9   : > { %1461 = vrcp.f32 %v1068_v49 }
 0x4cc   : > { %v1073_v50 = vpop.permute.xlu0 %1072 }
 0x4cd   : > { %1463 = vrcp.f32 %v1073_v50 }
 0x4d3   : > { %v1462_v52 = vpop.eup %1461 }
 0x4d4   : > { %v1076_v53 = vmul.f32 %v1462_v52, %v1059_v51 }
 0x4d6   : > { %1079 = vst [vmem:[#allocation6] sm:$0xff] %v1076_v53 }
 0x4d7   : > { %v1464_v55 = vpop.eup %1463 }
 0x4d8   : > { %v1078_v56 = vmul.f32 %v1464_v55, %v1060_v54 }
 0x4da   : > { %1080 = vst [vmem:[#allocation6 + $0x8] sm:$0xff] %v1078_v56 }
 0x4db PF: > { %p1434_p6 = scmp.eq.s32.totalorder %s1550_s22, 2  ;;  %s1506_s27 = smov [#allocation6]  }
 0x4dc   : > { %s1087_s30 = sshll.u32 %s1506_s27, 4  ;;  %s1088_s30 = int_to_ptr.vmem [resolvable:$true] %s1087_s30 }
 0x4dd   : > { %s1465_s17 = scalar_lea.vmem %s1088_s30, 256  ;;  %p1472_p10 = scmp.lt.s32.totalorder %s1088_s30, %s1088_s30 }
 0x4de   : > { %p1466_p7 = scmp.ne.s32.totalorder %s1088_s30, %s1465_s17  ;;  %p1473_p11 = scmp.lt.s32.totalorder %s1465_s17, %s1465_s17 }
 0x4e0   : > { %p1467_p8 = pnand %p1466_p7, %p1434_p6  ;;  %p1474_p12 = por %p1473_p11, %p1472_p10 }
 0x4e2   : > { %p1468_p9 = pneg %p1467_p8 }
 0x4e4   : > { %p1475_p13 = pnand %p1474_p12, %p1468_p9 }
 0x4e6   : > { %1478 = shalt.err (!%p1475_p13)
}
 0x4e7   : > { %s1479_s20 = scalar_lea.hbm %s1716_s6, 256 }
 0x4e8   : > { %p1480_p0 = scmp.ne.s32.totalorder %s1716_s6, %s1479_s20  ;;  %p1485_p3 = scmp.lt.u32.totalorder %s1479_s20, %s1716_s6 }
 0x4ea   : > { %p1481_p1 = pnand %p1480_p0, %p1434_p6 }
 0x4ec   : > { %p1482_p2 = pneg %p1481_p1 }
 0x4ee   : > { %p1487_p4 = pnand %p1485_p3, %p1482_p2 }
 0x4f0   : > { %1490 = shalt.err (!%p1487_p4)
}
 0x4f1   : > { %s1507_s28 = smov 128   ;;  %s1508_s29 = smov 8  }
 0x4f2   : > { %1431 = dma.vmem_to_hbm [thread:$0]  (%p1434_p6), %s1088_s30, 256, %s1716_s6, [#allocation7], %s1507_s28, %s1507_s28, %s1508_s29  }
 0x4f3   : > { %1496 = dma.done.wait (%p1434_p6), [#allocation7], 256  }
 0x4f4   : > { %1498 = vsyncadd (%p1434_p6), [#allocation7], 4294967040 }
 0x4f5 PF: > { %s17_s21 = sadd.s32 1, %s1501_s21  }
 0x4f6   : > { %p14_p5 = scmp.ge.s32.totalorder %s17_s21, 5  }
 0x4f8   :  { %16 = sbr.rel (!%p14_p5) target bundleno = 1 (0x1), region = 82 }
 0x4ff   :  { %1103 = vsyncpa [#allocation7], 1 }
 0x500   :  { %1105 = vsyncpa [#allocation7 + $0x1], 1 }

</bundles_post_ra>
